<compile_context>
chip_gen: v6e
topology: v6e:2x2x1
jax: 0.10.0
libtpu: 0.0.40
codegen_flags: <defaults>
</compile_context>

<pallas_src>
from functools import partial

import jax
import jax.numpy as jnp
from jax import lax
from jax.experimental import pallas as pl
from jax.experimental.pallas import tpu as pltpu

BN_EPS = 1e-5                 # PyTorch BatchNorm2d default
MXU_DTYPE = jnp.float32       # bf16 halves x/W HBM+VMEM traffic on every gen (v5e's MXU
                              # is bf16-native) but adds ~4e-3 rel. error to the conv;
                              # kept f32 so the 2e-4 check below holds.  BN stats stay f32.


def _round_up(x, m):
    return (x + m - 1) // m * m


def _conv_stats_kernel(x_ref, w_ref, mask_ref, conv_ref, sum_ref, sumsq_ref, stack_ref,
                       *, wp, nb):
    """One grid step = `nb` images.

    x_ref    : (nb, Cin, Sp_ext)   zero-padded, spatially-flattened input slab
    w_ref    : (Cout, 9*Cin)       conv weight with the 9 taps stacked along K
    mask_ref : (1, Sp_pad)         1.0 at valid output positions, 0.0 at padding slots
    conv_ref : (nb, Cout, Sp_pad)  conv output (padded-spatial, lane-dense)
    sum_ref  : (1, Cout, 128)      per-step lane-partial sum   (reduced in the wrapper)
    sumsq_ref: (1, Cout, 128)      per-step lane-partial sumsq (reduced in the wrapper)
    stack_ref: (9*Cin, Sp_pad)     VMEM scratch: 9 lane-shifted taps stacked along K
    """
    cin = x_ref.shape[1]
    cout, sp_pad = conv_ref.shape[1], conv_ref.shape[2]
    n_chunks = sp_pad // 128

    mask = mask_ref[...]                                   # (1, Sp_pad)
    sum_acc = jnp.zeros((cout, 128), jnp.float32)
    sumsq_acc = jnp.zeros((cout, 128), jnp.float32)

    for b in range(nb):                                    # static unroll over images
        # Stack the 9 taps (constant lane shifts of the same slab) along K.
        for t in range(9):
            kh, kw = t // 3, t % 3
            d = kh * wp + kw                               # static flat lane shift
            stack_ref[t * cin:(t + 1) * cin, :] = x_ref[b, :, d:d + sp_pad]

        # Single MXU matmul per image: (Cout, 9*Cin) @ (9*Cin, Sp_pad).
        acc = jnp.dot(w_ref[...], stack_ref[...], preferred_element_type=jnp.float32)
        conv_ref[b] = acc

        # BN batch statistics over valid positions: lane-partial VPU adds only; the
        # single cross-lane reduction happens once, in the wrapper.
        masked = acc * mask
        masked_sq = acc * masked
        for c in range(n_chunks):
            sl = slice(c * 128, (c + 1) * 128)
            sum_acc = sum_acc + masked[:, sl]
            sumsq_acc = sumsq_acc + masked_sq[:, sl]

    sum_ref[0] = sum_acc
    sumsq_ref[0] = sumsq_acc


def _bn_elu_kernel(conv_ref, scale_ref, shift_ref, out_ref, *, nb):
    """y = conv * scale + shift (folded BatchNorm batch stats), then ELU(alpha=1)."""
    scale = scale_ref[...]                                 # (Cout, 1)
    shift = shift_ref[...]
    for b in range(nb):
        y = conv_ref[b] * scale + shift
        out_ref[b] = jnp.where(y > 0.0, y, jnp.expm1(y))


def _pick_batch_block(n, per_image_bytes, fixed_bytes, budget=12 << 20):
    """Largest divisor of n whose double-buffered per-step blocks fit a VMEM budget."""
    best = 1
    for nb in range(1, n + 1):
        if n % nb == 0 and fixed_bytes + 2 * nb * per_image_bytes <= budget:
            best = nb
    return best


def music_conv_block(x, weight, bias, gamma, beta):
    """x: (N, Cin, H, W) f32.  weight: (Cout, Cin, 3, 3).  Returns (N, Cout, H, W) f32."""
    del bias  # exact no-op under training-mode BatchNorm (cancels in mean subtraction)
    # TODO(synk): re-add the conv bias if this block is ever run with eval-mode
    # (running-statistics) BatchNorm.
    N, Cin, H, W = x.shape
    Cout, _, KH, KW = weight.shape
    assert (KH, KW) == (3, 3)

    Hp, Wp = H + 2, W + 2
    Sp = Hp * Wp                                  # padded-spatial flat output frame
    Sp_pad = _round_up(Sp, 128)                   # lane-dense (unmasked) stores
    shift_max = 2 * Wp + 2                        # largest flat tap shift
    rows_total = -(-(Sp_pad + shift_max) // Wp)   # enough zero rows below the frame so
    extra_rows = rows_total - Hp                  # every tap slice stays in-bounds
    Sp_ext = rows_total * Wp

    # One zero-pad + flatten of x; no im2col buffer ever touches HBM.
    x_ext = jnp.pad(x, ((0, 0), (0, 0), (1, 1 + extra_rows), (1, 1)))
    x_ext = x_ext.reshape(N, Cin, Sp_ext).astype(MXU_DTYPE)
    # TODO(synk): this pad/reshape and the final slice are extra XLA HBM passes; for peak
    # mem-bound perf fold them into pass 1/2 via H-tiled BlockSpecs with a 2-row halo.

    # Taps stacked along K: column index = (kh*3 + kw)*Cin + ci.
    w_stacked = weight.transpose(0, 2, 3, 1).reshape(Cout, 9 * Cin).astype(MXU_DTYPE)

    # Valid-output mask over the padded, lane-padded frame (h < H and w < W, s < Sp).
    mask2d = (jnp.arange(Hp)[:, None] < H) & (jnp.arange(Wp)[None, :] < W)
    mask = jnp.pad(mask2d.reshape(1, Sp).astype(jnp.float32), ((0, 0), (0, Sp_pad - Sp)))

    itemsize = jnp.dtype(MXU_DTYPE).itemsize
    per_image = Cin * Sp_ext * itemsize + Cout * Sp_pad * 4
    fixed = 9 * Cin * Sp_pad * itemsize + Cout * 9 * Cin * itemsize + Sp_pad * 4
    Nb = _pick_batch_block(N, per_image, fixed)
    n_blocks = N // Nb

    # ---- Pass 1: tap-stacked conv + per-step lane-partial BN statistics -------------
    conv_flat, psum, psumsq = pl.pallas_call(
        partial(_conv_stats_kernel, wp=Wp, nb=Nb),
        grid=(n_blocks,),
        in_specs=[
            pl.BlockSpec((Nb, Cin, Sp_ext), lambda n: (n, 0, 0)),  # per-step image slab
            pl.BlockSpec((Cout, 9 * Cin), lambda n: (0, 0)),       # resident weights
            pl.BlockSpec((1, Sp_pad), lambda n: (0, 0)),           # resident mask
        ],
        out_specs=(
            pl.BlockSpec((Nb, Cout, Sp_pad), lambda n: (n, 0, 0)),
            pl.BlockSpec((1, Cout, 128), lambda n: (n, 0, 0)),     # per-step partials ->
            pl.BlockSpec((1, Cout, 128), lambda n: (n, 0, 0)),     # no resident acc
        ),
        out_shape=(
            jax.ShapeDtypeStruct((N, Cout, Sp_pad), jnp.float32),
            jax.ShapeDtypeStruct((n_blocks, Cout, 128), jnp.float32),
            jax.ShapeDtypeStruct((n_blocks, Cout, 128), jnp.float32),
        ),
        scratch_shapes=[pltpu.VMEM((9 * Cin, Sp_pad), MXU_DTYPE)],
        compiler_params=pltpu.CompilerParams(dimension_semantics=("parallel",)),
    )(x_ext, w_stacked, mask)

    # ---- Fold BatchNorm (batch mean, biased variance) into one scale/shift ----------
    count = jnp.float32(N * H * W)
    sums = jnp.sum(psum, axis=(0, 2))
    sumsqs = jnp.sum(psumsq, axis=(0, 2))
    mean = sums / count
    var = jnp.maximum(sumsqs / count - mean * mean, 0.0)
    # TODO(synk): switch to mean-shifted / compensated accumulation if N*H*W grows large
    # enough for E[x^2]-E[x]^2 cancellation to exceed tolerance.
    scale = gamma * lax.rsqrt(var + BN_EPS)
    shift = beta - mean * scale

    # ---- Pass 2: y = conv * scale + shift, ELU ---------------------------------------
    out_flat = pl.pallas_call(
        partial(_bn_elu_kernel, nb=Nb),
        grid=(n_blocks,),
        in_specs=[
            pl.BlockSpec((Nb, Cout, Sp_pad), lambda n: (n, 0, 0)),
            pl.BlockSpec((Cout, 1), lambda n: (0, 0)),
            pl.BlockSpec((Cout, 1), lambda n: (0, 0)),
        ],
        out_specs=pl.BlockSpec((Nb, Cout, Sp_pad), lambda n: (n, 0, 0)),
        out_shape=jax.ShapeDtypeStruct((N, Cout, Sp_pad), jnp.float32),
        compiler_params=pltpu.CompilerParams(dimension_semantics=("parallel",)),
    )(conv_flat, scale.reshape(Cout, 1), shift.reshape(Cout, 1))
    # TODO(synk): when Cout >= Cin, cut the f32 conv round trip by making pass 1
    # stats-only and recomputing the conv fused with BN+ELU in pass 2 (or store the
    # intermediate in bf16 with a looser tolerance).
    # TODO(synk): for very large images (per-step slabs beyond a few MiB), add a second
    # grid axis over H-tiles with a 2-row halo and size vmem_limit_bytes to the blocks.

    return out_flat[:, :, :Sp].reshape(N, Cout, Hp, Wp)[:, :, :H, :W]


def reference(x, weight, bias, gamma, beta):
    """Plain-JAX reference mirroring the PyTorch forward (training-mode BN)."""
    conv = lax.conv_general_dilated(
        x, weight, window_strides=(1, 1), padding=((1, 1), (1, 1)),
        dimension_numbers=("NCHW", "OIHW", "NCHW"),
    ) + bias[None, :, None, None]
    mean = jnp.mean(conv, axis=(0, 2, 3), keepdims=True)
    var = jnp.mean((conv - mean) ** 2, axis=(0, 2, 3), keepdims=True)
    y = (conv - mean) / jnp.sqrt(var + BN_EPS)
    y = y * gamma[None, :, None, None] + beta[None, :, None, None]
    return jnp.where(y > 0.0, y, jnp.expm1(y))


if __name__ == "__main__":
    key = jax.random.PRNGKey(0)
    k_x, k_w, k_b, k_g, k_be = jax.random.split(key, 5)

    N, Cin, H, W = 2, 4, 16, 16
    Cout = 8

    x = jax.random.normal(k_x, (N, Cin, H, W), dtype=jnp.float32)
    # deterministic synthetic parameters (Conv2d: weight (Cout, Cin, 3, 3), bias (Cout,))
    fan_in = Cin * 3 * 3
    bound = 1.0 / (fan_in ** 0.5)
    weight = jax.random.uniform(k_w, (Cout, Cin, 3, 3), jnp.float32, -bound, bound)
    bias = jax.random.uniform(k_b, (Cout,), jnp.float32, -bound, bound)
    # BatchNorm2d affine params (torch init: gamma=1, beta=0; perturb to exercise them)
    gamma = 1.0 + 0.1 * jax.random.normal(k_g, (Cout,), jnp.float32)
    beta = 0.1 * jax.random.normal(k_be, (Cout,), jnp.float32)

    out = music_conv_block(x, weight, bias, gamma, beta)
    out = jax.block_until_ready(out)

    ref = jax.block_until_ready(reference(x, weight, bias, gamma, beta))
    assert out.shape == (N, Cout, H, W)
    assert jnp.allclose(out, ref, atol=2e-4, rtol=2e-4)

    print("KERNEL_OK")
</pallas_src>

<mosaic_0001>
module attributes {stable_mosaic.version = 11 : i64} {
  func.func @_conv_stats_kernel(%arg0: i32, %arg1: memref<2x4x432xf32, #tpu.memory_space<vmem>>, %arg2: memref<8x36xf32, #tpu.memory_space<vmem>>, %arg3: memref<1x384xf32, #tpu.memory_space<vmem>>, %arg4: memref<2x8x384xf32, #tpu.memory_space<vmem>>, %arg5: memref<1x8x128xf32, #tpu.memory_space<vmem>>, %arg6: memref<1x8x128xf32, #tpu.memory_space<vmem>>, %arg7: memref<36x384xf32, #tpu.memory_space<vmem>>) attributes {dimension_semantics = [#tpu.dimension_semantics<parallel>], iteration_bounds = array<i64: 1>, scalar_prefetch = 0 : i64, scratch_operands = 1 : i64, tpu.core_type = #tpu.core_type<tc>, window_params = [{transform_indices = @transform_0, window_bounds = array<i64: 2, 4, 432>}, {pipeline_mode = #tpu.pipeline_mode<synchronous>, transform_indices = @transform_1, window_bounds = array<i64: 8, 36>}, {pipeline_mode = #tpu.pipeline_mode<synchronous>, transform_indices = @transform_2, window_bounds = array<i64: 1, 384>}, {transform_indices = @transform_3, window_bounds = array<i64: 2, 8, 384>}, {transform_indices = @transform_4, window_bounds = array<i64: 1, 8, 128>}, {transform_indices = @transform_5, window_bounds = array<i64: 1, 8, 128>}]} {
    %c0 = arith.constant 0 : index
    %c0_0 = arith.constant 0 : index
    %0 = vector.load %arg3[%c0, %c0_0] : memref<1x384xf32, #tpu.memory_space<vmem>>, vector<1x384xf32>
    %cst = arith.constant 0.000000e+00 : f32
    %1 = vector.broadcast %cst : f32 to vector<8x128xf32>
    %cst_1 = arith.constant 0.000000e+00 : f32
    %2 = vector.broadcast %cst_1 : f32 to vector<8x128xf32>
    %c0_2 = arith.constant 0 : index
    %c0_3 = arith.constant 0 : index
    %c0_4 = arith.constant 0 : index
    %3 = vector.load %arg1[%c0_2, %c0_3, %c0_4] : memref<2x4x432xf32, #tpu.memory_space<vmem>>, vector<1x4x384xf32>
    %4 = vector.shape_cast %3 : vector<1x4x384xf32> to vector<4x384xf32>
    %c0_5 = arith.constant 0 : index
    %c0_6 = arith.constant 0 : index
    %5 = vector.load %arg7[%c0_5, %c0_6] : memref<36x384xf32, #tpu.memory_space<vmem>>, vector<4x384xf32>
    tpu.vector_store %arg7[%c0_5, %c0_6], %4 {strides = array<i32>} : memref<36x384xf32, #tpu.memory_space<vmem>>, vector<4x384xf32>,
    %c0_7 = arith.constant 0 : index
    %c0_8 = arith.constant 0 : index
    %c1 = arith.constant 1 : index
    %6 = vector.load %arg1[%c0_7, %c0_8, %c1] : memref<2x4x432xf32, #tpu.memory_space<vmem>>, vector<1x4x384xf32>
    %7 = vector.shape_cast %6 : vector<1x4x384xf32> to vector<4x384xf32>
    %c4 = arith.constant 4 : index
    %c0_9 = arith.constant 0 : index
    %8 = vector.load %arg7[%c4, %c0_9] : memref<36x384xf32, #tpu.memory_space<vmem>>, vector<4x384xf32>
    tpu.vector_store %arg7[%c4, %c0_9], %7 {strides = array<i32>} : memref<36x384xf32, #tpu.memory_space<vmem>>, vector<4x384xf32>,
    %c0_10 = arith.constant 0 : index
    %c0_11 = arith.constant 0 : index
    %c2 = arith.constant 2 : index
    %9 = vector.load %arg1[%c0_10, %c0_11, %c2] : memref<2x4x432xf32, #tpu.memory_space<vmem>>, vector<1x4x384xf32>
    %10 = vector.shape_cast %9 : vector<1x4x384xf32> to vector<4x384xf32>
    %c8 = arith.constant 8 : index
    %c0_12 = arith.constant 0 : index
    %11 = vector.load %arg7[%c8, %c0_12] : memref<36x384xf32, #tpu.memory_space<vmem>>, vector<4x384xf32>
    tpu.vector_store %arg7[%c8, %c0_12], %10 {strides = array<i32>} : memref<36x384xf32, #tpu.memory_space<vmem>>, vector<4x384xf32>,
    %c0_13 = arith.constant 0 : index
    %c0_14 = arith.constant 0 : index
    %c18 = arith.constant 18 : index
    %12 = vector.load %arg1[%c0_13, %c0_14, %c18] : memref<2x4x432xf32, #tpu.memory_space<vmem>>, vector<1x4x384xf32>
    %13 = vector.shape_cast %12 : vector<1x4x384xf32> to vector<4x384xf32>
    %c12 = arith.constant 12 : index
    %c0_15 = arith.constant 0 : index
    %14 = vector.load %arg7[%c12, %c0_15] : memref<36x384xf32, #tpu.memory_space<vmem>>, vector<4x384xf32>
    tpu.vector_store %arg7[%c12, %c0_15], %13 {strides = array<i32>} : memref<36x384xf32, #tpu.memory_space<vmem>>, vector<4x384xf32>,
    %c0_16 = arith.constant 0 : index
    %c0_17 = arith.constant 0 : index
    %c19 = arith.constant 19 : index
    %15 = vector.load %arg1[%c0_16, %c0_17, %c19] : memref<2x4x432xf32, #tpu.memory_space<vmem>>, vector<1x4x384xf32>
    %16 = vector.shape_cast %15 : vector<1x4x384xf32> to vector<4x384xf32>
    %c16 = arith.constant 16 : index
    %c0_18 = arith.constant 0 : index
    %17 = vector.load %arg7[%c16, %c0_18] : memref<36x384xf32, #tpu.memory_space<vmem>>, vector<4x384xf32>
    tpu.vector_store %arg7[%c16, %c0_18], %16 {strides = array<i32>} : memref<36x384xf32, #tpu.memory_space<vmem>>, vector<4x384xf32>,
    %c0_19 = arith.constant 0 : index
    %c0_20 = arith.constant 0 : index
    %c20 = arith.constant 20 : index
    %18 = vector.load %arg1[%c0_19, %c0_20, %c20] : memref<2x4x432xf32, #tpu.memory_space<vmem>>, vector<1x4x384xf32>
    %19 = vector.shape_cast %18 : vector<1x4x384xf32> to vector<4x384xf32>
    %c20_21 = arith.constant 20 : index
    %c0_22 = arith.constant 0 : index
    %20 = vector.load %arg7[%c20_21, %c0_22] : memref<36x384xf32, #tpu.memory_space<vmem>>, vector<4x384xf32>
    tpu.vector_store %arg7[%c20_21, %c0_22], %19 {strides = array<i32>} : memref<36x384xf32, #tpu.memory_space<vmem>>, vector<4x384xf32>,
    %c0_23 = arith.constant 0 : index
    %c0_24 = arith.constant 0 : index
    %c36 = arith.constant 36 : index
    %21 = vector.load %arg1[%c0_23, %c0_24, %c36] : memref<2x4x432xf32, #tpu.memory_space<vmem>>, vector<1x4x384xf32>
    %22 = vector.shape_cast %21 : vector<1x4x384xf32> to vector<4x384xf32>
    %c24 = arith.constant 24 : index
    %c0_25 = arith.constant 0 : index
    %23 = vector.load %arg7[%c24, %c0_25] : memref<36x384xf32, #tpu.memory_space<vmem>>, vector<4x384xf32>
    tpu.vector_store %arg7[%c24, %c0_25], %22 {strides = array<i32>} : memref<36x384xf32, #tpu.memory_space<vmem>>, vector<4x384xf32>,
    %c0_26 = arith.constant 0 : index
    %c0_27 = arith.constant 0 : index
    %c37 = arith.constant 37 : index
    %24 = vector.load %arg1[%c0_26, %c0_27, %c37] : memref<2x4x432xf32, #tpu.memory_space<vmem>>, vector<1x4x384xf32>
    %25 = vector.shape_cast %24 : vector<1x4x384xf32> to vector<4x384xf32>
    %c28 = arith.constant 28 : index
    %c0_28 = arith.constant 0 : index
    %26 = vector.load %arg7[%c28, %c0_28] : memref<36x384xf32, #tpu.memory_space<vmem>>, vector<4x384xf32>
    tpu.vector_store %arg7[%c28, %c0_28], %25 {strides = array<i32>} : memref<36x384xf32, #tpu.memory_space<vmem>>, vector<4x384xf32>,
    %c0_29 = arith.constant 0 : index
    %c0_30 = arith.constant 0 : index
    %c38 = arith.constant 38 : index
    %27 = vector.load %arg1[%c0_29, %c0_30, %c38] : memref<2x4x432xf32, #tpu.memory_space<vmem>>, vector<1x4x384xf32>
    %28 = vector.shape_cast %27 : vector<1x4x384xf32> to vector<4x384xf32>
    %c32 = arith.constant 32 : index
    %c0_31 = arith.constant 0 : index
    %29 = vector.load %arg7[%c32, %c0_31] : memref<36x384xf32, #tpu.memory_space<vmem>>, vector<4x384xf32>
    tpu.vector_store %arg7[%c32, %c0_31], %28 {strides = array<i32>} : memref<36x384xf32, #tpu.memory_space<vmem>>, vector<4x384xf32>,
    %c0_32 = arith.constant 0 : index
    %c0_33 = arith.constant 0 : index
    %30 = vector.load %arg2[%c0_32, %c0_33] : memref<8x36xf32, #tpu.memory_space<vmem>>, vector<8x36xf32>
    %c0_34 = arith.constant 0 : index
    %c0_35 = arith.constant 0 : index
    %31 = vector.load %arg7[%c0_34, %c0_35] : memref<36x384xf32, #tpu.memory_space<vmem>>, vector<36x384xf32>
    %cst_36 = arith.constant dense<0.000000e+00> : vector<8x384xf32>
    %32 = tpu.matmul %30, %31, %cst_36 {dimension_numbers = #tpu.dot_dimension_numbers<[1], [0], [0], [1], [0, 0, 1, 1], [], []>} : vector<8x36xf32>, vector<36x384xf32>, vector<8x384xf32> -> vector<8x384xf32>
    %c0_37 = arith.constant 0 : index
    %c0_38 = arith.constant 0 : index
    %c0_39 = arith.constant 0 : index
    %33 = vector.load %arg4[%c0_37, %c0_38, %c0_39] : memref<2x8x384xf32, #tpu.memory_space<vmem>>, vector<1x8x384xf32>
    %34 = vector.shape_cast %33 : vector<1x8x384xf32> to vector<8x384xf32>
    %35 = vector.shape_cast %32 : vector<8x384xf32> to vector<1x8x384xf32>
    tpu.vector_store %arg4[%c0_37, %c0_38, %c0_39], %35 {strides = array<i32>} : memref<2x8x384xf32, #tpu.memory_space<vmem>>, vector<1x8x384xf32>,
    %36 = vector.broadcast %0 : vector<1x384xf32> to vector<8x384xf32>
    %37 = arith.mulf %32, %36 : vector<8x384xf32>
    %38 = arith.mulf %32, %37 : vector<8x384xf32>
    %39 = vector.extract_strided_slice %37 {offsets = [0, 0], sizes = [8, 128], strides = [1, 1]} : vector<8x384xf32> to vector<8x128xf32>
    %40 = arith.addf %1, %39 : vector<8x128xf32>
    %41 = vector.extract_strided_slice %38 {offsets = [0, 0], sizes = [8, 128], strides = [1, 1]} : vector<8x384xf32> to vector<8x128xf32>
    %42 = arith.addf %2, %41 : vector<8x128xf32>
    %43 = vector.extract_strided_slice %37 {offsets = [0, 128], sizes = [8, 128], strides = [1, 1]} : vector<8x384xf32> to vector<8x128xf32>
    %44 = arith.addf %40, %43 : vector<8x128xf32>
    %45 = vector.extract_strided_slice %38 {offsets = [0, 128], sizes = [8, 128], strides = [1, 1]} : vector<8x384xf32> to vector<8x128xf32>
    %46 = arith.addf %42, %45 : vector<8x128xf32>
    %47 = vector.extract_strided_slice %37 {offsets = [0, 256], sizes = [8, 128], strides = [1, 1]} : vector<8x384xf32> to vector<8x128xf32>
    %48 = arith.addf %44, %47 : vector<8x128xf32>
    %49 = vector.extract_strided_slice %38 {offsets = [0, 256], sizes = [8, 128], strides = [1, 1]} : vector<8x384xf32> to vector<8x128xf32>
    %50 = arith.addf %46, %49 : vector<8x128xf32>
    %c1_40 = arith.constant 1 : index
    %c0_41 = arith.constant 0 : index
    %c0_42 = arith.constant 0 : index
    %51 = vector.load %arg1[%c1_40, %c0_41, %c0_42] : memref<2x4x432xf32, #tpu.memory_space<vmem>>, vector<1x4x384xf32>
    %52 = vector.shape_cast %51 : vector<1x4x384xf32> to vector<4x384xf32>
    %c0_43 = arith.constant 0 : index
    %c0_44 = arith.constant 0 : index
    %53 = vector.load %arg7[%c0_43, %c0_44] : memref<36x384xf32, #tpu.memory_space<vmem>>, vector<4x384xf32>
    tpu.vector_store %arg7[%c0_43, %c0_44], %52 {strides = array<i32>} : memref<36x384xf32, #tpu.memory_space<vmem>>, vector<4x384xf32>,
    %c1_45 = arith.constant 1 : index
    %c0_46 = arith.constant 0 : index
    %c1_47 = arith.constant 1 : index
    %54 = vector.load %arg1[%c1_45, %c0_46, %c1_47] : memref<2x4x432xf32, #tpu.memory_space<vmem>>, vector<1x4x384xf32>
    %55 = vector.shape_cast %54 : vector<1x4x384xf32> to vector<4x384xf32>
    %c4_48 = arith.constant 4 : index
    %c0_49 = arith.constant 0 : index
    %56 = vector.load %arg7[%c4_48, %c0_49] : memref<36x384xf32, #tpu.memory_space<vmem>>, vector<4x384xf32>
    tpu.vector_store %arg7[%c4_48, %c0_49], %55 {strides = array<i32>} : memref<36x384xf32, #tpu.memory_space<vmem>>, vector<4x384xf32>,
    %c1_50 = arith.constant 1 : index
    %c0_51 = arith.constant 0 : index
    %c2_52 = arith.constant 2 : index
    %57 = vector.load %arg1[%c1_50, %c0_51, %c2_52] : memref<2x4x432xf32, #tpu.memory_space<vmem>>, vector<1x4x384xf32>
    %58 = vector.shape_cast %57 : vector<1x4x384xf32> to vector<4x384xf32>
    %c8_53 = arith.constant 8 : index
    %c0_54 = arith.constant 0 : index
    %59 = vector.load %arg7[%c8_53, %c0_54] : memref<36x384xf32, #tpu.memory_space<vmem>>, vector<4x384xf32>
    tpu.vector_store %arg7[%c8_53, %c0_54], %58 {strides = array<i32>} : memref<36x384xf32, #tpu.memory_space<vmem>>, vector<4x384xf32>,
    %c1_55 = arith.constant 1 : index
    %c0_56 = arith.constant 0 : index
    %c18_57 = arith.constant 18 : index
    %60 = vector.load %arg1[%c1_55, %c0_56, %c18_57] : memref<2x4x432xf32, #tpu.memory_space<vmem>>, vector<1x4x384xf32>
    %61 = vector.shape_cast %60 : vector<1x4x384xf32> to vector<4x384xf32>
    %c12_58 = arith.constant 12 : index
    %c0_59 = arith.constant 0 : index
    %62 = vector.load %arg7[%c12_58, %c0_59] : memref<36x384xf32, #tpu.memory_space<vmem>>, vector<4x384xf32>
    tpu.vector_store %arg7[%c12_58, %c0_59], %61 {strides = array<i32>} : memref<36x384xf32, #tpu.memory_space<vmem>>, vector<4x384xf32>,
    %c1_60 = arith.constant 1 : index
    %c0_61 = arith.constant 0 : index
    %c19_62 = arith.constant 19 : index
    %63 = vector.load %arg1[%c1_60, %c0_61, %c19_62] : memref<2x4x432xf32, #tpu.memory_space<vmem>>, vector<1x4x384xf32>
    %64 = vector.shape_cast %63 : vector<1x4x384xf32> to vector<4x384xf32>
    %c16_63 = arith.constant 16 : index
    %c0_64 = arith.constant 0 : index
    %65 = vector.load %arg7[%c16_63, %c0_64] : memref<36x384xf32, #tpu.memory_space<vmem>>, vector<4x384xf32>
    tpu.vector_store %arg7[%c16_63, %c0_64], %64 {strides = array<i32>} : memref<36x384xf32, #tpu.memory_space<vmem>>, vector<4x384xf32>,
    %c1_65 = arith.constant 1 : index
    %c0_66 = arith.constant 0 : index
    %c20_67 = arith.constant 20 : index
    %66 = vector.load %arg1[%c1_65, %c0_66, %c20_67] : memref<2x4x432xf32, #tpu.memory_space<vmem>>, vector<1x4x384xf32>
    %67 = vector.shape_cast %66 : vector<1x4x384xf32> to vector<4x384xf32>
    %c20_68 = arith.constant 20 : index
    %c0_69 = arith.constant 0 : index
    %68 = vector.load %arg7[%c20_68, %c0_69] : memref<36x384xf32, #tpu.memory_space<vmem>>, vector<4x384xf32>
    tpu.vector_store %arg7[%c20_68, %c0_69], %67 {strides = array<i32>} : memref<36x384xf32, #tpu.memory_space<vmem>>, vector<4x384xf32>,
    %c1_70 = arith.constant 1 : index
    %c0_71 = arith.constant 0 : index
    %c36_72 = arith.constant 36 : index
    %69 = vector.load %arg1[%c1_70, %c0_71, %c36_72] : memref<2x4x432xf32, #tpu.memory_space<vmem>>, vector<1x4x384xf32>
    %70 = vector.shape_cast %69 : vector<1x4x384xf32> to vector<4x384xf32>
    %c24_73 = arith.constant 24 : index
    %c0_74 = arith.constant 0 : index
    %71 = vector.load %arg7[%c24_73, %c0_74] : memref<36x384xf32, #tpu.memory_space<vmem>>, vector<4x384xf32>
    tpu.vector_store %arg7[%c24_73, %c0_74], %70 {strides = array<i32>} : memref<36x384xf32, #tpu.memory_space<vmem>>, vector<4x384xf32>,
    %c1_75 = arith.constant 1 : index
    %c0_76 = arith.constant 0 : index
    %c37_77 = arith.constant 37 : index
    %72 = vector.load %arg1[%c1_75, %c0_76, %c37_77] : memref<2x4x432xf32, #tpu.memory_space<vmem>>, vector<1x4x384xf32>
    %73 = vector.shape_cast %72 : vector<1x4x384xf32> to vector<4x384xf32>
    %c28_78 = arith.constant 28 : index
    %c0_79 = arith.constant 0 : index
    %74 = vector.load %arg7[%c28_78, %c0_79] : memref<36x384xf32, #tpu.memory_space<vmem>>, vector<4x384xf32>
    tpu.vector_store %arg7[%c28_78, %c0_79], %73 {strides = array<i32>} : memref<36x384xf32, #tpu.memory_space<vmem>>, vector<4x384xf32>,
    %c1_80 = arith.constant 1 : index
    %c0_81 = arith.constant 0 : index
    %c38_82 = arith.constant 38 : index
    %75 = vector.load %arg1[%c1_80, %c0_81, %c38_82] : memref<2x4x432xf32, #tpu.memory_space<vmem>>, vector<1x4x384xf32>
    %76 = vector.shape_cast %75 : vector<1x4x384xf32> to vector<4x384xf32>
    %c32_83 = arith.constant 32 : index
    %c0_84 = arith.constant 0 : index
    %77 = vector.load %arg7[%c32_83, %c0_84] : memref<36x384xf32, #tpu.memory_space<vmem>>, vector<4x384xf32>
    tpu.vector_store %arg7[%c32_83, %c0_84], %76 {strides = array<i32>} : memref<36x384xf32, #tpu.memory_space<vmem>>, vector<4x384xf32>,
    %c0_85 = arith.constant 0 : index
    %c0_86 = arith.constant 0 : index
    %78 = vector.load %arg2[%c0_85, %c0_86] : memref<8x36xf32, #tpu.memory_space<vmem>>, vector<8x36xf32>
    %c0_87 = arith.constant 0 : index
    %c0_88 = arith.constant 0 : index
    %79 = vector.load %arg7[%c0_87, %c0_88] : memref<36x384xf32, #tpu.memory_space<vmem>>, vector<36x384xf32>
    %cst_89 = arith.constant dense<0.000000e+00> : vector<8x384xf32>
    %80 = tpu.matmul %78, %79, %cst_89 {dimension_numbers = #tpu.dot_dimension_numbers<[1], [0], [0], [1], [0, 0, 1, 1], [], []>} : vector<8x36xf32>, vector<36x384xf32>, vector<8x384xf32> -> vector<8x384xf32>
    %c1_90 = arith.constant 1 : index
    %c0_91 = arith.constant 0 : index
    %c0_92 = arith.constant 0 : index
    %81 = vector.load %arg4[%c1_90, %c0_91, %c0_92] : memref<2x8x384xf32, #tpu.memory_space<vmem>>, vector<1x8x384xf32>
    %82 = vector.shape_cast %81 : vector<1x8x384xf32> to vector<8x384xf32>
    %83 = vector.shape_cast %80 : vector<8x384xf32> to vector<1x8x384xf32>
    tpu.vector_store %arg4[%c1_90, %c0_91, %c0_92], %83 {strides = array<i32>} : memref<2x8x384xf32, #tpu.memory_space<vmem>>, vector<1x8x384xf32>,
    %84 = vector.broadcast %0 : vector<1x384xf32> to vector<8x384xf32>
    %85 = arith.mulf %80, %84 : vector<8x384xf32>
    %86 = arith.mulf %80, %85 : vector<8x384xf32>
    %87 = vector.extract_strided_slice %85 {offsets = [0, 0], sizes = [8, 128], strides = [1, 1]} : vector<8x384xf32> to vector<8x128xf32>
    %88 = arith.addf %48, %87 : vector<8x128xf32>
    %89 = vector.extract_strided_slice %86 {offsets = [0, 0], sizes = [8, 128], strides = [1, 1]} : vector<8x384xf32> to vector<8x128xf32>
    %90 = arith.addf %50, %89 : vector<8x128xf32>
    %91 = vector.extract_strided_slice %85 {offsets = [0, 128], sizes = [8, 128], strides = [1, 1]} : vector<8x384xf32> to vector<8x128xf32>
    %92 = arith.addf %88, %91 : vector<8x128xf32>
    %93 = vector.extract_strided_slice %86 {offsets = [0, 128], sizes = [8, 128], strides = [1, 1]} : vector<8x384xf32> to vector<8x128xf32>
    %94 = arith.addf %90, %93 : vector<8x128xf32>
    %95 = vector.extract_strided_slice %85 {offsets = [0, 256], sizes = [8, 128], strides = [1, 1]} : vector<8x384xf32> to vector<8x128xf32>
    %96 = arith.addf %92, %95 : vector<8x128xf32>
    %97 = vector.extract_strided_slice %86 {offsets = [0, 256], sizes = [8, 128], strides = [1, 1]} : vector<8x384xf32> to vector<8x128xf32>
    %98 = arith.addf %94, %97 : vector<8x128xf32>
    %c0_93 = arith.constant 0 : index
    %c0_94 = arith.constant 0 : index
    %c0_95 = arith.constant 0 : index
    %99 = vector.load %arg5[%c0_93, %c0_94, %c0_95] : memref<1x8x128xf32, #tpu.memory_space<vmem>>, vector<1x8x128xf32>
    %100 = vector.shape_cast %99 : vector<1x8x128xf32> to vector<8x128xf32>
    %101 = vector.shape_cast %96 : vector<8x128xf32> to vector<1x8x128xf32>
    tpu.vector_store %arg5[%c0_93, %c0_94, %c0_95], %101 {strides = array<i32>} : memref<1x8x128xf32, #tpu.memory_space<vmem>>, vector<1x8x128xf32>,
    %c0_96 = arith.constant 0 : index
    %c0_97 = arith.constant 0 : index
    %c0_98 = arith.constant 0 : index
    %102 = vector.load %arg6[%c0_96, %c0_97, %c0_98] : memref<1x8x128xf32, #tpu.memory_space<vmem>>, vector<1x8x128xf32>
    %103 = vector.shape_cast %102 : vector<1x8x128xf32> to vector<8x128xf32>
    %104 = vector.shape_cast %98 : vector<8x128xf32> to vector<1x8x128xf32>
    tpu.vector_store %arg6[%c0_96, %c0_97, %c0_98], %104 {strides = array<i32>} : memref<1x8x128xf32, #tpu.memory_space<vmem>>, vector<1x8x128xf32>,
    return
  }
  func.func @transform_0(%arg0: i32) -> (i32, i32, i32) {
    %c0_i32 = arith.constant 0 : i32
    %c0_i32_0 = arith.constant 0 : i32
    %c0_i32_1 = arith.constant 0 : i32
    return %arg0, %c0_i32, %c0_i32_0 : i32, i32, i32
  }
  func.func @transform_1(%arg0: i32) -> (i32, i32) {
    %c0_i32 = arith.constant 0 : i32
    %c0_i32_0 = arith.constant 0 : i32
    %c0_i32_1 = arith.constant 0 : i32
    return %c0_i32, %c0_i32_0 : i32, i32
  }
  func.func @transform_2(%arg0: i32) -> (i32, i32) {
    %c0_i32 = arith.constant 0 : i32
    %c0_i32_0 = arith.constant 0 : i32
    %c0_i32_1 = arith.constant 0 : i32
    return %c0_i32, %c0_i32_0 : i32, i32
  }
  func.func @transform_3(%arg0: i32) -> (i32, i32, i32) {
    %c0_i32 = arith.constant 0 : i32
    %c0_i32_0 = arith.constant 0 : i32
    %c0_i32_1 = arith.constant 0 : i32
    return %arg0, %c0_i32, %c0_i32_0 : i32, i32, i32
  }
  func.func @transform_4(%arg0: i32) -> (i32, i32, i32) {
    %c0_i32 = arith.constant 0 : i32
    %c0_i32_0 = arith.constant 0 : i32
    %c0_i32_1 = arith.constant 0 : i32
    return %arg0, %c0_i32, %c0_i32_0 : i32, i32, i32
  }
  func.func @transform_5(%arg0: i32) -> (i32, i32, i32) {
    %c0_i32 = arith.constant 0 : i32
    %c0_i32_0 = arith.constant 0 : i32
    %c0_i32_1 = arith.constant 0 : i32
    return %arg0, %c0_i32, %c0_i32_0 : i32, i32, i32
  }
}

</mosaic_0001>

<bundles_post_ra>
// kernel: tpu_custom_call.1
= control target key start
LH: loop header
LB: loop body
LE: loop exit
PB: predicated region body
PF: predicated region fallthrough
CT: control target
= control target key end

     0   :  { %11 = vsyncpa [#allocation4], 0  ;;  %s1335_s0 = inlined_call_operand.hbm [shape: f32[2,4,432], index: 0, kind: input, shape index: {}]   ;;  %s1336_s1 = inlined_call_operand.hbm [shape: f32[8,36], index: 1, kind: input, shape index: {}]   ;;  %s1337_s2 = inlined_call_operand.vmem [shape: f32[1,384], index: 2, kind: input, shape index: {}]   ;;  %s1338_s3 = inlined_call_operand.hbm [shape: f32[2,8,384], index: 3, kind: output, shape index: {0}]   ;;  %s1339_s4 = inlined_call_operand.hbm [shape: f32[1,8,128], index: 4, kind: output, shape index: {1}]   ;;  %s1340_s5 = inlined_call_operand.hbm [shape: f32[1,8,128], index: 5, kind: output, shape index: {2}]  }
   0x1   :  { %12 = vsyncpa [#allocation7], 0 }
   0x2   :  { %13 = vsyncpa [#allocation5], 0 }
   0x3   :  { %14 = vsyncpa [#allocation10], 0  ;;  %s1056_s18 = smov [#allocation3]  }
   0x4   :  { %s20_s19 = sshll.u32 %s1056_s18, 4  ;;  %s21_s19 = int_to_ptr.vmem [resolvable:$true] %s20_s19 }
   0x5   :  { %s956_s20 = scalar_lea.vmem %s21_s19, 512  ;;  %p961_p1 = scmp.lt.s32.totalorder %s21_s19, %s21_s19 }
   0x6   :  { %p957_p0 = scmp.ne.s32.totalorder %s21_s19, %s956_s20  ;;  %p962_p2 = scmp.lt.s32.totalorder %s956_s20, %s956_s20 }
   0x8   :  { %p963_p3 = por %p962_p2, %p961_p1 }
   0xa   :  { %p964_p4 = pnand %p963_p3, %p957_p0 }
   0xc   :  { %967 = shalt.err (!%p964_p4)
}
   0xd   :  { %s1057_s21 = smov 256   ;;  %s1058_s22 = smov 16  }
   0xe   :  { %26 = dma.hbm_to_vmem [thread:$0]  %s1335_s0, 512, %s21_s19, [#allocation4], %s1057_s21, %s1057_s21, %s1058_s22  }
   0xf   :  { %s1059_s25 = smov [#allocation6]  }
  0x10   :  { %s33_s26 = sshll.u32 %s1059_s25, 4  ;;  %s34_s26 = int_to_ptr.vmem [resolvable:$true] %s33_s26 }
  0x11   :  { %s976_s27 = scalar_lea.vmem %s34_s26, 128  ;;  %p981_p6 = scmp.lt.s32.totalorder %s34_s26, %s34_s26 }
  0x12   :  { %p977_p5 = scmp.ne.s32.totalorder %s34_s26, %s976_s27  ;;  %p982_p7 = scmp.lt.s32.totalorder %s976_s27, %s976_s27 }
  0x14   :  { %p983_p8 = por %p982_p7, %p981_p6 }
  0x16   :  { %p984_p9 = pnand %p983_p8, %p977_p5 }
  0x18   :  { %987 = shalt.err (!%p984_p9)
}
  0x19   :  { %36 = dma.hbm_to_vmem [thread:$0]  %s1336_s1, 128, %s34_s26, [#allocation7]  }
  0x1a   :  { %1048 = dma.done.wait [#allocation4], 512  }
  0x1b   :  { %1049 = vsyncadd [#allocation4], 4294966784 }
  0x1c   :  { %1050 = dma.done.wait [#allocation7], 128  }
  0x1d   :  { %1051 = vsyncadd [#allocation7], 4294967168  ;;  %v1111_v0 = vld [vmem:[#allocation3 + $0x8] sm:$0xff]  ;;  %v222_v1 = vld [vmem:[#allocation3] sm:$0xff]  ;;  %s1060_s0 = smov 90   ;;  %s1061_s30 = smov 91  }
  0x1e   :  { %232 = vrot.lane.b32.xlu0 %v1111_v0, %s1060_s0  ;;  %228 = vrot.lane.b32.xlu1 %v222_v1, %s1060_s0  ;;  %v226_v2 = vcombine.high %v222_v1, %v222_v1  ;;  %51 = vst [vmem:[#allocation2 + $0x30] sm:$0xf] %v222_v1  ;;  %s1062_s1 = smov 92   ;;  %v203_v3 = vcombine.low %v1111_v0, %v1111_v0  ;;  %s1063_s6 = smov 109   ;;  %v1065_v5 = vmov 0.0   ;;  %v1150_v7 = vld [vmem:[#allocation3 + $0x10] sm:$0xff] }
  0x1f   :  { %v202_v4 = vcombine.low %v222_v1, %v222_v1  ;;  %s1064_s7 = smov 108   ;;  %895 = vmatprep.subr.mxu1 %v1065_v5  ;;  %340 = vmatprep.mubr.f32.mxu0 %v1065_v5  ;;  %v227_v6 = vcombine.high %v1111_v0, %v1111_v0  ;;  %s1066_s8 = smov 126   ;;  %v1156_v8 = vcombine.high %v1150_v7, %v1150_v7  ;;  %v619_v9 = vld [vmem:[#allocation3 + $0x18] sm:$0xff]  ;;  %v47_v10 = vld [vmem:[#allocation3 + $0x8] sm:$0xf]  ;;  %vm1069_vm0 = vmmov 0  }
  0x20   :  { %52 = vst [vmem:[#allocation2] sm:$0xf] %v226_v2  ;;  %s1067_s9 = smov 110   ;;  %s1068_s10 = smov 127   ;;  %53 = vst [vmem:[#allocation2 + $0x58] sm:$0xf] %v47_v10  ;;  %v600_v11 = vcombine.low %v619_v9, %v619_v9  ;;  %v599_v12 = vcombine.low %v1150_v7, %v1150_v7  ;;  %905 = vmatprep.mubr.msk.f32.mxu1 %vm1069_vm0, %v1065_v5  ;;  %v623_v13 = vcombine.high %v619_v9, %v619_v9 }
  0x21   :  { %vm236_vm1 = vcmask 736256   ;;  %vm188_vm2 = vcmask 752640   ;;  %vm212_vm3 = vcmask 744448   ;;  %vm266_vm4 = vcmask 1043456   ;;  %s1071_s14 = smov [#allocation9]   ;;  %s1072_s16 = smov [#allocation11]  }
  0x22   :  { %206 = vrot.lane.b32.xlu1 %v222_v1, %s1061_s30  ;;  %184 = vrot.lane.b32.xlu0 %v1111_v0, %s1062_s1  ;;  %vm140_vm5 = vcmask 891904   ;;  %vm164_vm6 = vcmask 883712   ;;  %vm92_vm7 = vcmask 1031168   ;;  %vm116_vm8 = vcmask 900096   ;;  %s846_s15 = sshll.u32 %s1071_s14, 4  ;;  %s856_s17 = sshll.u32 %s1072_s16, 4  ;;  %s847_s15 = int_to_ptr.vmem [resolvable:$true] %s846_s15  ;;  %s857_s17 = int_to_ptr.vmem [resolvable:$true] %s856_s17 }
  0x23   :  { %vm68_vm9 = vcmask 1039360   ;;  %vm262_vm10 = vcmask 293888  }
  0x26   :  { %230 = vrot.lane.b32.xlu0 %v226_v2, %s1060_s0  ;;  %182 = vrot.lane.b32.xlu1 %v226_v2, %s1062_s1 }
  0x2a   :  { %208 = vrot.lane.b32.xlu0 %v203_v3, %s1061_s30  ;;  %180 = vrot.lane.b32.xlu1 %v222_v1, %s1062_s1 }
  0x2e   :  { %204 = vrot.lane.b32.xlu0 %v202_v4, %s1061_s30  ;;  %134 = vrot.lane.b32.xlu1 %v226_v2, %s1063_s6 }
  0x32   :  { %136 = vrot.lane.b32.xlu0 %v1111_v0, %s1063_s6  ;;  %158 = vrot.lane.b32.xlu1 %v222_v1, %s1064_s7 }
  0x36   :  { %160 = vrot.lane.b32.xlu0 %v203_v3, %s1064_s7  ;;  %132 = vrot.lane.b32.xlu1 %v222_v1, %s1063_s6 }
  0x3a   :  { %156 = vrot.lane.b32.xlu0 %v202_v4, %s1064_s7  ;;  %234 = vrot.lane.b32.xlu1 %v227_v6, %s1060_s0 }
  0x3e   :  { %88 = vrot.lane.b32.xlu1 %v1111_v0, %s1066_s8  ;;  %86 = vrot.lane.b32.xlu0 %v226_v2, %s1066_s8 }
  0x42   :  { %112 = vrot.lane.b32.xlu1 %v203_v3, %s1067_s9  ;;  %110 = vrot.lane.b32.xlu0 %v222_v1, %s1067_s9 }
  0x46   :  { %108 = vrot.lane.b32.xlu1 %v202_v4, %s1067_s9  ;;  %84 = vrot.lane.b32.xlu0 %v222_v1, %s1066_s8 }
  0x4a   :  { %210 = vrot.lane.b32.xlu1 %v1111_v0, %s1061_s30  ;;  %186 = vrot.lane.b32.xlu0 %v227_v6, %s1062_s1 }
  0x4e   :  { %64 = vrot.lane.b32.xlu1 %v203_v3, %s1068_s10  ;;  %62 = vrot.lane.b32.xlu0 %v222_v1, %s1068_s10 }
  0x52   :  { %138 = vrot.lane.b32.xlu1 %v227_v6, %s1063_s6  ;;  %60 = vrot.lane.b32.xlu0 %v202_v4, %s1068_s10 }
  0x56   :  { %626 = vrot.lane.b32.xlu1 %v1156_v8, %s1060_s0  ;;  %162 = vrot.lane.b32.xlu0 %v1111_v0, %s1064_s7 }
  0x5a   :  { %90 = vrot.lane.b32.xlu1 %v227_v6, %s1066_s8  ;;  %628 = vrot.lane.b32.xlu0 %v619_v9, %s1060_s0 }
  0x5e   :  { %624 = vrot.lane.b32.xlu1 %v1150_v7, %s1060_s0  ;;  %114 = vrot.lane.b32.xlu0 %v1111_v0, %s1067_s9 }
  0x62   :  { %582 = vrot.lane.b32.xlu1 %v619_v9, %s1062_s1  ;;  %580 = vrot.lane.b32.xlu0 %v1156_v8, %s1062_s1 }
  0x66   :  { %605 = vrot.lane.b32.xlu1 %v600_v11, %s1061_s30  ;;  %603 = vrot.lane.b32.xlu0 %v1150_v7, %s1061_s30 }
  0x6a   :  { %578 = vrot.lane.b32.xlu1 %v1150_v7, %s1062_s1  ;;  %66 = vrot.lane.b32.xlu0 %v1111_v0, %s1068_s10 }
  0x6e   :  { %534 = vrot.lane.b32.xlu1 %v1156_v8, %s1063_s6  ;;  %601 = vrot.lane.b32.xlu0 %v599_v12, %s1061_s30 }
  0x72   :  { %557 = vrot.lane.b32.xlu1 %v1150_v7, %s1064_s7  ;;  %536 = vrot.lane.b32.xlu0 %v619_v9, %s1063_s6 }
  0x76   :  { %532 = vrot.lane.b32.xlu1 %v1150_v7, %s1063_s6  ;;  %559 = vrot.lane.b32.xlu0 %v600_v11, %s1064_s7 }
  0x7a   :  { %630 = vrot.lane.b32.xlu1 %v623_v13, %s1060_s0  ;;  %555 = vrot.lane.b32.xlu0 %v599_v12, %s1064_s7 }
  0x7e   :  { %490 = vrot.lane.b32.xlu1 %v619_v9, %s1066_s8  ;;  %488 = vrot.lane.b32.xlu0 %v1156_v8, %s1066_s8 }
  0x82   :  { %513 = vrot.lane.b32.xlu1 %v600_v11, %s1067_s9  ;;  %511 = vrot.lane.b32.xlu0 %v1150_v7, %s1067_s9 }
  0x86   :  { %509 = vrot.lane.b32.xlu1 %v599_v12, %s1067_s9  ;;  %486 = vrot.lane.b32.xlu0 %v1150_v7, %s1066_s8 }
  0x8a   :  { %607 = vrot.lane.b32.xlu1 %v619_v9, %s1061_s30  ;;  %584 = vrot.lane.b32.xlu0 %v623_v13, %s1062_s1 }
  0x8e   :  { %467 = vrot.lane.b32.xlu1 %v600_v11, %s1068_s10  ;;  %465 = vrot.lane.b32.xlu0 %v1150_v7, %s1068_s10 }
  0x90   :  { %v233_v14 = vpop.permute.xlu0 %232  ;;  %v229_v15 = vpop.permute.xlu1 %228 }
  0x92   :  { %538 = vrot.lane.b32.xlu1 %v623_v13, %s1063_s6  ;;  %463 = vrot.lane.b32.xlu0 %v599_v12, %s1068_s10 }
  0x94   :  { %v207_v16 = vpop.permute.xlu1 %206  ;;  %v1209_v17 = vpop.permute.xlu0 %184 }
  0x96   :  { %492 = vrot.lane.b32.xlu1 %v623_v13, %s1066_s8  ;;  %561 = vrot.lane.b32.xlu0 %v619_v9, %s1064_s7 }
  0x98   :  { %v231_v18 = vpop.permute.xlu0 %230  ;;  %v183_v19 = vpop.permute.xlu1 %182 }
  0x99   :  { %v237_v20 = vsel %vm236_vm1, %v229_v15, %v231_v18  ;;  %v238_v21 = vsel %vm236_vm1, %v231_v18, %v233_v14  ;;  %v190_v22 = vsel %vm188_vm2, %v183_v19, %v1209_v17 }
  0x9a   :  { %243 = vst [vmem:[#allocation2 + $0x60] sm:$0xf] %v237_v20  ;;  %244 = vst [vmem:[#allocation2 + $0x70] sm:$0xf] %v238_v21  ;;  %469 = vrot.lane.b32.xlu1 %v619_v9, %s1068_s10  ;;  %515 = vrot.lane.b32.xlu0 %v619_v9, %s1067_s9 }
  0x9b   :  { %196 = vst [vmem:[#allocation2 + $0x10] sm:$0xf] %v190_v22 }
  0x9c   :  { %v1219_v23 = vpop.permute.xlu0 %208  ;;  %v181_v24 = vpop.permute.xlu1 %180 }
  0x9d   :  { %v214_v25 = vsel %vm212_vm3, %v207_v16, %v1219_v23  ;;  %v189_v26 = vsel %vm188_vm2, %v181_v24, %v183_v19 }
  0x9e   :  { %220 = vst [vmem:[#allocation2 + $0x10] sm:$0xf0] %v214_v25  ;;  %195 = vst [vmem:[#allocation2 + $0x20] sm:$0xf] %v189_v26 }
  0xa0   :  { %v205_v27 = vpop.permute.xlu0 %204  ;;  %v135_v28 = vpop.permute.xlu1 %134 }
  0xa1   :  { %v213_v29 = vsel %vm212_vm3, %v205_v27, %v207_v16  ;;  %v260_v30 = vld [vmem:[#allocation2 + $0x70] sm:$0xf]  ;;  %v259_v31 = vld [vmem:[#allocation2 + $0x60] sm:$0xf] }
  0xa2   :  { %219 = vst [vmem:[#allocation2 + $0x20] sm:$0xf0] %v213_v29  ;;  %873 = vmatprep.subr.msk.mxu0 %vm266_vm4, %v260_v30 }
  0xa3   :  { %874 = vmatpush1.msk.msra.mxu0 %vm266_vm4, %v259_v31 }
  0xa4   :  { %v137_v32 = vpop.permute.xlu0 %136  ;;  %v159_v33 = vpop.permute.xlu1 %158 }
  0xa5   :  { %v142_v34 = vsel %vm140_vm5, %v135_v28, %v137_v32  ;;  %v257_v35 = vld [vmem:[#allocation2 + $0x10] sm:$0xff] }
  0xa6   :  { %148 = vst [vmem:[#allocation2 + $0x48] sm:$0xf] %v142_v34  ;;  %300 = vmatprep.subr.mxu0 %v257_v35 }
  0xa8   :  { %v1228_v36 = vpop.permute.xlu0 %160  ;;  %v133_v37 = vpop.permute.xlu1 %132 }
  0xa9   :  { %v166_v38 = vsel %vm164_vm6, %v159_v33, %v1228_v36  ;;  %v141_v39 = vsel %vm140_vm5, %v133_v37, %v135_v28  ;;  %v256_v40 = vld [vmem:[#allocation2 + $0x20] sm:$0xff] }
  0xaa   :  { %172 = vst [vmem:[#allocation2 + $0x48] sm:$0xf0] %v166_v38  ;;  %147 = vst [vmem:[#allocation2 + $0x8] sm:$0xf] %v141_v39  ;;  %301 = vmatpush1.msra.mxu0 %v256_v40 }
  0xac   :  { %v157_v41 = vpop.permute.xlu0 %156  ;;  %v235_v42 = vpop.permute.xlu1 %234 }
  0xad   :  { %v165_v43 = vsel %vm164_vm6, %v157_v41, %v159_v33  ;;  %v239_v44 = vsel %vm236_vm1, %v233_v14, %v235_v42  ;;  %v450_v41 = vld [vmem:[#allocation3 + $0x18] sm:$0xf] }
  0xae   :  { %171 = vst [vmem:[#allocation2 + $0x8] sm:$0xf0] %v165_v43  ;;  %245 = vst [vmem:[#allocation2 + $0x28] sm:$0xf] %v239_v44 }
  0xb0   :  { %v89_v45 = vpop.permute.xlu1 %88  ;;  %v87_v46 = vpop.permute.xlu0 %86 }
  0xb1   :  { %v94_v47 = vsel %vm92_vm7, %v87_v46, %v89_v45  ;;  %v254_v48 = vld [vmem:[#allocation2 + $0x48] sm:$0xff] }
  0xb2   :  { %100 = vst [vmem:[#allocation2 + $0x50] sm:$0xf] %v94_v47  ;;  %302 = vmatprep.subr.mxu0 %v254_v48 }
  0xb4   :  { %v1236_v49 = vpop.permute.xlu1 %112  ;;  %v111_v50 = vpop.permute.xlu0 %110 }
  0xb5   :  { %v118_v51 = vsel %vm116_vm8, %v111_v50, %v1236_v49  ;;  %v253_v52 = vld [vmem:[#allocation2 + $0x8] sm:$0xff] }
  0xb6   :  { %v261_v53 = vld [vmem:[#allocation2 + $0x28] sm:$0xf]  ;;  %124 = vst [vmem:[#allocation2 + $0x50] sm:$0xf0] %v118_v51  ;;  %303 = vmatpush1.msra.mxu0 %v253_v52 }
  0xb7   :  { %896 = vmatpush3.msk.msra.mxu1 %vm266_vm4, %v261_v53 }
  0xb8   :  { %897 = vmatprep.subr.mxu1 %v1065_v5  ;;  %v109_v54 = vpop.permute.xlu1 %108  ;;  %v85_v55 = vpop.permute.xlu0 %84 }
  0xb9   :  { %v117_v56 = vsel %vm116_vm8, %v109_v54, %v111_v50  ;;  %v93_v57 = vsel %vm92_vm7, %v85_v55, %v87_v46 }
  0xba   :  { %123 = vst [vmem:[#allocation2 + $0x18] sm:$0xf0] %v117_v56  ;;  %99 = vst [vmem:[#allocation2 + $0x18] sm:$0xf] %v93_v57 }
  0xbc   :  { %v211_v58 = vpop.permute.xlu1 %210  ;;  %v187_v59 = vpop.permute.xlu0 %186 }
  0xbd   :  { %v215_v60 = vsel %vm212_vm3, %v1219_v23, %v211_v58  ;;  %v191_v61 = vsel %vm188_vm2, %v1209_v17, %v187_v59  ;;  %v251_v62 = vld [vmem:[#allocation2 + $0x50] sm:$0xff]  ;;  %v1260_v17 = vld [vmem:[#allocation6] sm:$0xff] }
  0xbe   :  { %221 = vst [vmem:[#allocation2 + $0x38] sm:$0xf0] %v215_v60  ;;  %197 = vst [vmem:[#allocation2 + $0x38] sm:$0xf] %v191_v61  ;;  %304 = vmatprep.subr.mxu0 %v251_v62 }
  0xc0   :  { %v1248_v63 = vpop.permute.xlu1 %64  ;;  %v63_v0 = vpop.permute.xlu0 %62 }
  0xc1   :  { %v70_v1 = vsel %vm68_vm9, %v63_v0, %v1248_v63  ;;  %v250_v2 = vld [vmem:[#allocation2 + $0x18] sm:$0xff] }
  0xc2   :  { %76 = vst [vmem:[#allocation2] sm:$0xf0] %v70_v1  ;;  %305 = vmatpush1.msra.mxu0 %v250_v2 }
  0xc4   :  { %v139_v3 = vpop.permute.xlu1 %138  ;;  %v61_v4 = vpop.permute.xlu0 %60 }
  0xc5   :  { %v143_v6 = vsel %vm140_vm5, %v137_v32, %v139_v3  ;;  %v69_v9 = vsel %vm68_vm9, %v61_v4, %v63_v0  ;;  %v258_v10 = vld [vmem:[#allocation2 + $0x38] sm:$0xff] }
  0xc6   :  { %149 = vst [vmem:[#allocation2 + $0x40] sm:$0xf] %v143_v6  ;;  %75 = vst [vmem:[#allocation2 + $0x30] sm:$0xf0] %v69_v9  ;;  %898 = vmatpush3.msra.mxu1 %v258_v10 }
  0xc7   :  { %899 = vmatprep.subr.mxu1 %v1065_v5 }
  0xc8   :  { %v627_v11 = vpop.permute.xlu1 %626  ;;  %v163_v12 = vpop.permute.xlu0 %162 }
  0xc9   :  { %v167_v13 = vsel %vm164_vm6, %v1228_v36, %v163_v12  ;;  %v248_v14 = vld [vmem:[#allocation2] sm:$0xff] }
  0xca   :  { %173 = vst [vmem:[#allocation2 + $0x40] sm:$0xf0] %v167_v13  ;;  %306 = vmatprep.subr.mxu0 %v248_v14  ;;  %455 = vst [vmem:[#allocation2] sm:$0xf] %v1156_v8 }
  0xcc   :  { %v91_v15 = vpop.permute.xlu1 %90  ;;  %v1258_v16 = vpop.permute.xlu0 %628 }
  0xcd   :  { %v95_v18 = vsel %vm92_vm7, %v89_v45, %v91_v15  ;;  %v633_v19 = vsel %vm236_vm1, %v627_v11, %v1258_v16  ;;  %v247_v20 = vld [vmem:[#allocation2 + $0x30] sm:$0xff] }
  0xce   :  { %101 = vst [vmem:[#allocation2 + $0x68] sm:$0xf] %v95_v18  ;;  %639 = vst [vmem:[#allocation2 + $0x70] sm:$0xf] %v633_v19  ;;  %307 = vmatpush1.msra.mxu0 %v247_v20 }
  0xcf   :  { %454 = vst [vmem:[#allocation2 + $0x30] sm:$0xf] %v1150_v7  ;;  %875 = vmatmul.mubr.msk.f32.vlgmr.msra.gmra.mxu0 %vm262_vm10, %v1260_v17 }
  0xd0   :  { %v625_v8 = vpop.permute.xlu1 %624  ;;  %v115_v21 = vpop.permute.xlu0 %114  ;;  %733 = vmatprep.mubr.f32.mxu0 %v1065_v5 }
  0xd1   :  { %v632_v22 = vsel %vm236_vm1, %v625_v8, %v627_v11  ;;  %v119_v23 = vsel %vm116_vm8, %v1236_v49, %v115_v21  ;;  %v255_v24 = vld [vmem:[#allocation2 + $0x40] sm:$0xff] }
  0xd2   :  { %638 = vst [vmem:[#allocation2 + $0x60] sm:$0xf] %v632_v22  ;;  %125 = vst [vmem:[#allocation2 + $0x68] sm:$0xf0] %v119_v23  ;;  %900 = vmatpush3.msra.mxu1 %v255_v24 }
  0xd3   :  { %901 = vmatprep.subr.mxu1 %v1065_v5 }
  0xd4   :  { %v1273_v25 = vpop.permute.xlu1 %582  ;;  %v581_v7 = vpop.permute.xlu0 %580 }
  0xd5   :  { %v587_v26 = vsel %vm188_vm2, %v581_v7, %v1273_v25  ;;  %v655_v27 = vld [vmem:[#allocation2 + $0x70] sm:$0xf] }
  0xd6   :  { %593 = vst [vmem:[#allocation2 + $0x10] sm:$0xf] %v587_v26  ;;  %878 = vmatprep.subr.msk.mxu0 %vm266_vm4, %v655_v27 }
  0xd8   :  { %v1278_v28 = vpop.permute.xlu1 %605  ;;  %v604_v29 = vpop.permute.xlu0 %603 }
  0xd9   :  { %v610_v30 = vsel %vm212_vm3, %v604_v29, %v1278_v28  ;;  %v252_v31 = vld [vmem:[#allocation2 + $0x68] sm:$0xff]  ;;  %v654_v32 = vld [vmem:[#allocation2 + $0x60] sm:$0xf] }
  0xda   :  { %616 = vst [vmem:[#allocation2 + $0x10] sm:$0xf0] %v610_v30  ;;  %902 = vmatpush3.msra.mxu1 %v252_v31  ;;  %879 = vmatpush1.msk.msra.mxu0 %vm266_vm4, %v654_v32 }
  0xdb   :  { %903 = vmatprep.subr.mxu1 %v1065_v5 }
  0xdc   :  { %v579_v33 = vpop.permute.xlu1 %578  ;;  %v67_v34 = vpop.permute.xlu0 %66 }
  0xdd   :  { %v586_v35 = vsel %vm188_vm2, %v579_v33, %v581_v7  ;;  %v71_v36 = vsel %vm68_vm9, %v1248_v63, %v67_v34  ;;  %v421_v33 = vlaneseq }
  0xde   :  { %592 = vst [vmem:[#allocation2 + $0x20] sm:$0xf] %v586_v35  ;;  %77 = vst [vmem:[#allocation2 + $0x58] sm:$0xf0] %v71_v36  ;;  %v45_v36 = vld [vmem:[%s1337_s2] sm:$0x7] }
  0xdf   :  { %v422_v34 = vshrl.u32 %v421_v33, 7  ;;  %s1070_s2 = smov [#allocation8]  }
  0xe0   :  { %v535_v37 = vpop.permute.xlu1 %534  ;;  %v602_v38 = vpop.permute.xlu0 %601  ;;  %s833_s13 = sshll.u32 %s1070_s2, 4  ;;  %s834_s13 = int_to_ptr.vmem [resolvable:$true] %s833_s13 }
  0xe1   :  { %v609_v39 = vsel %vm212_vm3, %v602_v38, %v604_v29  ;;  %v652_v40 = vld [vmem:[#allocation2 + $0x10] sm:$0xff]  ;;  %v423_v35 = vsub.s32 0, %v422_v34  ;;  %s988_s18 = scalar_lea.vmem %s834_s13, 768  ;;  %p993_p11 = scmp.lt.s32.totalorder %s834_s13, %s834_s13 }
  0xe2   :  { %615 = vst [vmem:[#allocation2 + $0x20] sm:$0xf0] %v609_v39  ;;  %693 = vmatprep.subr.mxu0 %v652_v40  ;;  %p989_p10 = scmp.ne.s32.totalorder %s834_s13, %s988_s18  ;;  %p994_p12 = scmp.lt.s32.totalorder %s988_s18, %s988_s18 }
  0xe3   :  { %v424_v38 = vrot.slane %v45_v36, %v423_v35 }
  0xe4   :  { %v558_v42 = vpop.permute.xlu1 %557  ;;  %v537_v43 = vpop.permute.xlu0 %536  ;;  %p995_p13 = por %p994_p12, %p993_p11 }
  0xe5   :  { %v541_v44 = vsel %vm140_vm5, %v535_v37, %v537_v43  ;;  %v249_v45 = vld [vmem:[#allocation2 + $0x58] sm:$0xff] }
  0xe6   :  { %547 = vst [vmem:[#allocation2 + $0x48] sm:$0xf] %v541_v44  ;;  %904 = vmatpush3.msra.mxu1 %v249_v45  ;;  %456 = vst [vmem:[#allocation2 + $0x58] sm:$0xf] %v450_v41  ;;  %p996_p0 = pnand %p995_p13, %p989_p10 }
  0xe7   :  { %908 = vmatprep.subr.mxu1 %v1065_v5  ;;  %906 = vmatmul.mubr.msk.f32.vlgmr.msra.gmra.mxu1 %vm262_vm10, %v1260_v17 }
  0xe8   :  { %v533_v46 = vpop.permute.xlu1 %532  ;;  %v560_v47 = vpop.permute.xlu0 %559  ;;  %918 = vmatprep.mubr.msk.f32.mxu1 %vm1069_vm0, %v1065_v5 }
  0xe9   :  { %v540_v48 = vsel %vm140_vm5, %v533_v46, %v535_v37  ;;  %v564_v49 = vsel %vm164_vm6, %v558_v42, %v560_v47  ;;  %v651_v50 = vld [vmem:[#allocation2 + $0x20] sm:$0xff]  ;;  %v427_v37 = vsub.s32 1, %v422_v34 }
  0xea   :  { %546 = vst [vmem:[#allocation2 + $0x8] sm:$0xf] %v540_v48  ;;  %570 = vst [vmem:[#allocation2 + $0x48] sm:$0xf0] %v564_v49  ;;  %694 = vmatpush1.msra.mxu0 %v651_v50  ;;  %v431_v48 = vsub.s32 2, %v422_v34 }
  0xeb   :  { %v428_v39 = vrot.slane %v45_v36, %v427_v37 }
  0xec   :  { %v631_v51 = vpop.permute.xlu1 %630  ;;  %v556_v52 = vpop.permute.xlu0 %555  ;;  %v432_v49 = vrot.slane %v45_v36, %v431_v48 }
  0xed   :  { %v634_v53 = vsel %vm236_vm1, %v1258_v16, %v631_v51  ;;  %v563_v54 = vsel %vm164_vm6, %v556_v52, %v558_v42 }
  0xee   :  { %640 = vst [vmem:[#allocation2 + $0x28] sm:$0xf] %v634_v53  ;;  %569 = vst [vmem:[#allocation2 + $0x8] sm:$0xf0] %v563_v54 }
  0xf0   :  { %v491_v55 = vpop.permute.xlu1 %490  ;;  %v489_v56 = vpop.permute.xlu0 %488 }
  0xf1   :  { %v495_v57 = vsel %vm92_vm7, %v489_v56, %v491_v55  ;;  %v649_v58 = vld [vmem:[#allocation2 + $0x48] sm:$0xff] }
  0xf2   :  { %501 = vst [vmem:[#allocation2 + $0x50] sm:$0xf] %v495_v57  ;;  %695 = vmatprep.subr.mxu0 %v649_v58 }
  0xf4   :  { %v514_v59 = vpop.permute.xlu1 %513  ;;  %v512_v60 = vpop.permute.xlu0 %511 }
  0xf5   :  { %v518_v61 = vsel %vm116_vm8, %v512_v60, %v514_v59  ;;  %v648_v62 = vld [vmem:[#allocation2 + $0x8] sm:$0xff] }
  0xf6   :  { %v656_v63 = vld [vmem:[#allocation2 + $0x28] sm:$0xf]  ;;  %524 = vst [vmem:[#allocation2 + $0x50] sm:$0xf0] %v518_v61  ;;  %696 = vmatpush1.msra.mxu0 %v648_v62 }
  0xf7   :  { %909 = vmatpush3.msk.msra.mxu1 %vm266_vm4, %v656_v63 }
  0xf8   :  { %910 = vmatprep.subr.mxu1 %v1065_v5  ;;  %v510_v0 = vpop.permute.xlu1 %509  ;;  %v487_v1 = vpop.permute.xlu0 %486 }
  0xf9   :  { %v517_v2 = vsel %vm116_vm8, %v510_v0, %v512_v60  ;;  %v494_v3 = vsel %vm92_vm7, %v487_v1, %v489_v56 }
  0xfa   :  { %523 = vst [vmem:[#allocation2 + $0x18] sm:$0xf0] %v517_v2  ;;  %500 = vst [vmem:[#allocation2 + $0x18] sm:$0xf] %v494_v3 }
  0xfc   :  { %v608_v4 = vpop.permute.xlu1 %607  ;;  %v585_v6 = vpop.permute.xlu0 %584 }
  0xfd   :  { %v611_v9 = vsel %vm212_vm3, %v1278_v28, %v608_v4  ;;  %v588_v10 = vsel %vm188_vm2, %v1273_v25, %v585_v6  ;;  %v646_v11 = vld [vmem:[#allocation2 + $0x50] sm:$0xff] }
  0xfe   :  { %617 = vst [vmem:[#allocation2 + $0x38] sm:$0xf0] %v611_v9  ;;  %594 = vst [vmem:[#allocation2 + $0x38] sm:$0xf] %v588_v10  ;;  %697 = vmatprep.subr.mxu0 %v646_v11 }
 0x100   :  { %v468_v12 = vpop.permute.xlu1 %467  ;;  %v466_v13 = vpop.permute.xlu0 %465 }
 0x101   :  { %v472_v14 = vsel %vm68_vm9, %v466_v13, %v468_v12  ;;  %v645_v15 = vld [vmem:[#allocation2 + $0x18] sm:$0xff] }
 0x102   :  { %478 = vst [vmem:[#allocation2] sm:$0xf0] %v472_v14  ;;  %698 = vmatpush1.msra.mxu0 %v645_v15 }
 0x104   :  { %v539_v16 = vpop.permute.xlu1 %538  ;;  %v464_v18 = vpop.permute.xlu0 %463 }
 0x105   :  { %v542_v19 = vsel %vm140_vm5, %v537_v43, %v539_v16  ;;  %v471_v20 = vsel %vm68_vm9, %v464_v18, %v466_v13  ;;  %v653_v8 = vld [vmem:[#allocation2 + $0x38] sm:$0xff] }
 0x106   :  { %548 = vst [vmem:[#allocation2 + $0x40] sm:$0xf] %v542_v19  ;;  %477 = vst [vmem:[#allocation2 + $0x30] sm:$0xf0] %v471_v20  ;;  %911 = vmatpush3.msra.mxu1 %v653_v8 }
 0x107   :  { %912 = vmatprep.subr.mxu1 %v1065_v5 }
 0x108   :  { %v493_v21 = vpop.permute.xlu1 %492  ;;  %v562_v22 = vpop.permute.xlu0 %561 }
 0x109   :  { %v496_v23 = vsel %vm92_vm7, %v491_v55, %v493_v21  ;;  %v565_v24 = vsel %vm164_vm6, %v560_v47, %v562_v22  ;;  %v643_v25 = vld [vmem:[#allocation2] sm:$0xff] }
 0x10a   :  { %502 = vst [vmem:[#allocation2 + $0x68] sm:$0xf] %v496_v23  ;;  %571 = vst [vmem:[#allocation2 + $0x40] sm:$0xf0] %v565_v24  ;;  %699 = vmatprep.subr.mxu0 %v643_v25 }
 0x10c   :  { %v470_v7 = vpop.permute.xlu1 %469  ;;  %v516_v26 = vpop.permute.xlu0 %515 }
 0x10d   :  { %v473_v27 = vsel %vm68_vm9, %v468_v12, %v470_v7  ;;  %v519_v28 = vsel %vm116_vm8, %v514_v59, %v516_v26  ;;  %v642_v29 = vld [vmem:[#allocation2 + $0x30] sm:$0xff] }
 0x10e   :  { %479 = vst [vmem:[#allocation2 + $0x58] sm:$0xf0] %v473_v27  ;;  %525 = vst [vmem:[#allocation2 + $0x68] sm:$0xf0] %v519_v28  ;;  %700 = vmatpush1.msra.mxu0 %v642_v29 }
 0x10f   :  { %880 = vmatmul.mubr.msk.f32.vlgmr.msra.gmra.mxu0 %vm262_vm10, %v1260_v17 }
 0x111   :  { %v650_v30 = vld [vmem:[#allocation2 + $0x40] sm:$0xff] }
 0x112   :  { %913 = vmatpush3.msra.mxu1 %v650_v30 }
 0x113   :  { %914 = vmatprep.subr.mxu1 %v1065_v5 }
 0x115   :  { %v647_v31 = vld [vmem:[#allocation2 + $0x68] sm:$0xff]  ;;  %v644_v32 = vld [vmem:[#allocation2 + $0x58] sm:$0xff] }
 0x116   :  { %915 = vmatpush3.msra.mxu1 %v647_v31 }
 0x117   :  { %916 = vmatprep.subr.mxu1 %v1065_v5 }
 0x118   :  { %917 = vmatpush3.msra.mxu1 %v644_v32 }
 0x119   :  { %919 = vmatmul.mubr.msk.f32.vlgmr.msra.gmra.mxu1 %vm262_vm10, %v1260_v17 }
 0x18f   :  { %v342_v40 = vpop.f32.mrf.mxu0 }
 0x190   :  { %417 = vst [vmem:[#allocation8] sm:$0xff] %v342_v40  ;;  %v436_v41 = vmul.f32 %v424_v38, %v342_v40 }
 0x191   :  { %v344_v42 = vpop.f32.mrf.mxu0 }
 0x192   :  { %v439_v5 = vmul.f32 %v436_v41, %v342_v40  ;;  %418 = vst [vmem:[#allocation8 + $0x8] sm:$0xff] %v344_v42  ;;  %v437_v43 = vmul.f32 %v428_v39, %v344_v42 }
 0x194   :  { %v440_v44 = vmul.f32 %v437_v43, %v344_v42  ;;  %v444_v45 = vadd.f32 %v437_v43, %v436_v41 }
 0x196   :  { %v445_v17 = vadd.f32 %v440_v44, %v439_v5 }
 0x1a7   :  { %v413_v46 = vpop.f32.mrf.mxu1 }
 0x1a8   :  { %419 = vst [vmem:[#allocation8 + $0x10] sm:$0xff] %v413_v46  ;;  %v438_v50 = vmul.f32 %v432_v49, %v413_v46 }
 0x1a9   :  { %v907_v47 = vpop.f32.mrf.mxu1 }
 0x1aa   :  { %v441_v52 = vmul.f32 %v438_v50, %v413_v46  ;;  %v446_v55 = vadd.f32 %v444_v45, %v438_v50 }
 0x1ac   :  { %v447_v56 = vadd.f32 %v445_v17, %v441_v52 }
 0x1cf   :  { %v735_v51 = vpop.f32.mrf.mxu0 }
 0x1d0   :  { %811 = vst [vmem:[#allocation8 + $0x18] sm:$0xff] %v735_v51  ;;  %v814_v53 = vmul.f32 %v735_v51, %v424_v38 }
 0x1d1   :  { %v737_v54 = vpop.f32.mrf.mxu0 }
 0x1d2   :  { %812 = vst [vmem:[#allocation8 + $0x20] sm:$0xff] %v737_v54  ;;  %v817_v57 = vmul.f32 %v814_v53, %v735_v51  ;;  %v815_v58 = vmul.f32 %v737_v54, %v428_v39  ;;  %v820_v59 = vadd.f32 %v814_v53, %v446_v55 }
 0x1d4   :  { %v821_v60 = vadd.f32 %v817_v57, %v447_v56  ;;  %v818_v61 = vmul.f32 %v815_v58, %v737_v54  ;;  %v822_v63 = vadd.f32 %v820_v59, %v815_v58 }
 0x1d9   :  { %v806_v62 = vpop.f32.mrf.mxu1 }
 0x1da   :  { %813 = vst [vmem:[#allocation8 + $0x28] sm:$0xff] %v806_v62  ;;  %v816_v0 = vmul.f32 %v806_v62, %v432_v49 }
 0x1db   :  { %v920_v1 = vpop.f32.mrf.mxu1 }
 0x1dc   :  { %999 = shalt.err (!%p996_p0)
}
 0x1dd   :  { %s1073_s19 = smov 384   ;;  %s1074_s20 = smov 24   ;;  %v823_v2 = vadd.f32 %v821_v60, %v818_v61  ;;  %v819_v3 = vmul.f32 %v816_v0, %v806_v62  ;;  %v824_v4 = vadd.f32 %v822_v63, %v816_v0 }
 0x1de   :  { %839 = dma.vmem_to_hbm [thread:$0]  %s834_s13, 768, %s1338_s3, [#allocation5], %s1073_s19, %s1073_s19, %s1074_s20  }
 0x1df   :  { %826 = vst [vmem:[#allocation9] sm:$0xff] %v824_v4  ;;  %v825_v6 = vadd.f32 %v823_v2, %v819_v3  ;;  %s1008_s23 = scalar_lea.vmem %s847_s15, 128  ;;  %p1013_p2 = scmp.lt.s32.totalorder %s847_s15, %s847_s15 }
 0x1e0   :  { %p1009_p1 = scmp.ne.s32.totalorder %s847_s15, %s1008_s23  ;;  %p1014_p3 = scmp.lt.s32.totalorder %s1008_s23, %s1008_s23 }
 0x1e2   :  { %p1015_p4 = por %p1014_p3, %p1013_p2 }
 0x1e4   :  { %p1016_p5 = pnand %p1015_p4, %p1009_p1 }
 0x1e6   :  { %1019 = shalt.err (!%p1016_p5)
}
 0x1e7   :  { %849 = dma.vmem_to_hbm [thread:$0]  %s847_s15, 128, %s1339_s4, [#allocation10]   ;;  %827 = vst [vmem:[#allocation11] sm:$0xff] %v825_v6 }
 0x1e8   :  { %s1028_s3 = scalar_lea.vmem %s857_s17, 128  ;;  %p1033_p7 = scmp.lt.s32.totalorder %s857_s17, %s857_s17 }
 0x1e9   :  { %p1029_p6 = scmp.ne.s32.totalorder %s857_s17, %s1028_s3  ;;  %p1034_p8 = scmp.lt.s32.totalorder %s1028_s3, %s1028_s3 }
 0x1eb   :  { %p1035_p9 = por %p1034_p8, %p1033_p7 }
 0x1ed   :  { %p1036_p10 = pnand %p1035_p9, %p1029_p6 }
 0x1ef   :  { %1039 = shalt.err (!%p1036_p10)
}
 0x1f0   :  { %859 = dma.vmem_to_hbm [thread:$0]  %s857_s17, 128, %s1340_s5, [#allocation10]  }
 0x1f1   :  { %1052 = dma.done.wait [#allocation5], 768  }
 0x1f2   :  { %1053 = vsyncadd [#allocation5], 4294966528 }
 0x1f3   :  { %1054 = dma.done.wait [#allocation10], 256  }
 0x1f4   :  { %1055 = vsyncadd [#allocation10], 4294967040 }
 0x1f5   :  { %869 = vsyncpa [#allocation4], 1 }
 0x1f6   :  { %870 = vsyncpa [#allocation7], 1 }
 0x1f7   :  { %871 = vsyncpa [#allocation5], 1 }
 0x1f8   :  { %872 = vsyncpa [#allocation10], 1 }

</bundles_post_ra>
